<compile_context>
chip_gen: v7x
topology: tpu7x:2x2x1
jax: 0.10.0
libtpu: 0.0.40
codegen_flags: <defaults>
</compile_context>

<pallas_src>
import functools

import jax
import jax.numpy as jnp
from jax import lax
from jax.experimental import pallas as pl
from jax.experimental.pallas import tpu as pltpu


# ---------------------------------------------------------------------------
# Pure-JAX periodic centered padding (pad1d_meta) -- used only by the reference.
# ---------------------------------------------------------------------------
def pad1d_meta(x, padding: int):
    if padding == 0:
        return x
    if padding % 2 != 0:
        raise ValueError("cannot do centered padding if padding is not even")
    left = x[..., -(padding // 2):]
    right = x[..., : padding // 2]
    return jnp.concatenate([left, x, right], axis=-1)


# ---------------------------------------------------------------------------
# Capability / hardware queries (cached)
# ---------------------------------------------------------------------------
@functools.lru_cache(maxsize=1)
def _vmem_limit_bytes():
    """~75% of physical VMEM (v7x: ~48 MiB, v5e/v6e: ~96 MiB); safe fallback."""
    try:
        cap = int(getattr(pltpu.get_tpu_info(), "vmem_capacity_bytes"))
        return int(cap * 3 // 4)
    except Exception:
        return 48 * 1024 * 1024


@functools.lru_cache(maxsize=None)
def _hw_roll_ok(c_in, length, dtype_name, shift):
    """One-time probe: does pltpu.roll lower for this shape/dtype and match jnp.roll?"""
    try:
        dtype = jnp.dtype(dtype_name)

        def probe_kernel(x_ref, o_ref):
            o_ref[...] = pltpu.roll(x_ref[...], shift, axis=-1)

        x = (jnp.arange(c_in * length, dtype=jnp.float32)
             .reshape(c_in, length).astype(dtype))
        out = jax.block_until_ready(
            pl.pallas_call(
                probe_kernel,
                out_shape=jax.ShapeDtypeStruct((c_in, length), dtype),
            )(x)
        )
        return bool(jnp.array_equal(out, jnp.roll(x, shift, axis=-1)))
    except Exception:
        return False


# ---------------------------------------------------------------------------
# Kernel
# ---------------------------------------------------------------------------
def _periodic_shift(x, s: int, length: int, use_hw_roll: bool):
    """out[..., i] = x[..., (i - s) % length]  (static shift s in [0, length))."""
    if s == 0:
        return x
    if use_hw_roll:
        return pltpu.roll(x, s, axis=-1)
    return jnp.concatenate([x[..., length - s:], x[..., : length - s]], axis=-1)


def _conv1d_kernel(x_ref, w_ref, b_ref, o_ref, *, kernel_size, dilation,
                   pad_left, l_tile, num_l_tiles, use_hw_roll):
    # x_ref: (1, C_in, L)  -- resident across the L-tile grid axis
    # w_ref: (K, C_out, C_in)   b_ref: (C_out, 1) f32   o_ref: (1, C_out, L_TILE)
    x = x_ref[0]                      # (C_in, L)
    L = x.shape[-1]

    if num_l_tiles > 1:
        start = pl.multiple_of(pl.program_id(1) * l_tile, 128)

    acc = None
    for k in range(kernel_size):      # K is small and static -> fully unrolled
        s = (pad_left - k * dilation) % L
        xk = _periodic_shift(x, s, L, use_hw_roll)
        if num_l_tiles > 1:
            xk = lax.dynamic_slice_in_dim(xk, start, l_tile, axis=1)
        part = jnp.dot(w_ref[k], xk, preferred_element_type=jnp.float32)
        acc = part if acc is None else acc + part

    # Bias: one f32 broadcast VPU add per output vreg, then cast once.
    o_ref[0] = (acc + b_ref[...]).astype(o_ref.dtype)


# ---------------------------------------------------------------------------
# Wrapper
# ---------------------------------------------------------------------------
def conv1d_meta_forward(x, weight, bias, *, kernel_size, dilation=1,
                        compute_dtype=jnp.bfloat16, l_tile=512):
    """Periodic-padded Conv1d (stride=1, groups=1).

    x: (B, C_in, L)   weight: (C_out, C_in, K)   bias: (C_out,)  ->  (B, C_out, L)
    compute_dtype: MXU operand dtype (default bf16, MXU-native). Accumulation is
                   f32, bias is added in f32, output dtype matches x.
                   Pass None to keep f32 operands.
    """
    padding = (kernel_size - 1) * dilation
    if padding % 2 != 0:
        raise ValueError("cannot do centered padding if padding is not even")
    pad_left = padding // 2

    B, c_in, L = x.shape
    c_out = weight.shape[0]
    if pad_left > L:
        raise ValueError("padding//2 must not exceed the input length")

    cdt = jnp.dtype(x.dtype if compute_dtype is None else compute_dtype)

    # L tiling: only when L splits cleanly into lane-dense (multiple-of-128) tiles.
    if (l_tile is not None and L > l_tile and l_tile % 128 == 0 and L % l_tile == 0):
        lt = l_tile
    else:
        lt = L
    num_l = L // lt

    # Wrapper-side layout plumbing (free):
    #   w_taps[k] == weight[:, :, k]  -> kernel never does a strided lane slice.
    w_taps = jnp.transpose(weight, (2, 0, 1)).astype(cdt)        # (K, C_out, C_in)
    b_col = bias.reshape(c_out, 1).astype(jnp.float32)           # bias stays f32
    x_c = x.astype(cdt)

    # Decide the roll path once per (shape, dtype) config.
    shifts = sorted({(pad_left - k * dilation) % L for k in range(kernel_size)} - {0})
    use_hw_roll = bool(shifts) and _hw_roll_ok(c_in, L, cdt.name, shifts[0])

    kernel = functools.partial(
        _conv1d_kernel, kernel_size=kernel_size, dilation=dilation,
        pad_left=pad_left, l_tile=lt, num_l_tiles=num_l, use_hw_roll=use_hw_roll,
    )

    return pl.pallas_call(
        kernel,
        out_shape=jax.ShapeDtypeStruct((B, c_out, L), x.dtype),
        grid_spec=pltpu.PrefetchScalarGridSpec(
            num_scalar_prefetch=0,
            grid=(B, num_l),
            in_specs=[
                # x stays resident across the L-tile axis (index_map ignores l).
                pl.BlockSpec((1, c_in, L), lambda b, l: (b, 0, 0)),
                pl.BlockSpec((kernel_size, c_out, c_in), lambda b, l: (0, 0, 0)),
                pl.BlockSpec((c_out, 1), lambda b, l: (0, 0)),
            ],
            out_specs=pl.BlockSpec((1, c_out, lt), lambda b, l: (b, 0, l)),
        ),
        compiler_params=pltpu.CompilerParams(
            # Both axes independent -> megacore (v7x) gets work even at B=1.
            dimension_semantics=("parallel", "parallel"),
            vmem_limit_bytes=_vmem_limit_bytes(),
        ),
    )(x_c, w_taps, b_col)


# ---------------------------------------------------------------------------
# Pure-JAX reference (independent formulation: explicit pad + per-tap einsum)
# ---------------------------------------------------------------------------
def conv1d_meta_reference(x, weight, bias, *, kernel_size, dilation=1):
    padding = (kernel_size - 1) * dilation
    x_pad = pad1d_meta(x, padding)
    l_out = x_pad.shape[-1] - dilation * (kernel_size - 1)
    out = jnp.zeros((x.shape[0], weight.shape[0], l_out), jnp.float32)
    for k in range(kernel_size):
        xs = x_pad[:, :, k * dilation: k * dilation + l_out]
        out = out + jnp.einsum("oc,bcl->bol", weight[:, :, k], xs)
    return (out + bias[None, :, None]).astype(x.dtype)


if __name__ == "__main__":
    # Small shapes consistent with the module's forward: NCL input.
    B, C_IN, C_OUT, L, K = 2, 4, 8, 16, 3
    DILATION = 1

    key = jax.random.PRNGKey(0)
    kx, kw, kb = jax.random.split(key, 3)

    x = jax.random.normal(kx, (B, C_IN, L), dtype=jnp.float32)
    fan_in = C_IN * K
    bound = 1.0 / (fan_in ** 0.5)
    weight = jax.random.uniform(kw, (C_OUT, C_IN, K), jnp.float32, -bound, bound)
    bias = jax.random.uniform(kb, (C_OUT,), jnp.float32, -bound, bound)

    ref = conv1d_meta_reference(x, weight, bias, kernel_size=K, dilation=DILATION)

    # Default path: bf16 MXU operands, f32 accumulation, f32 bias/output.
    out = conv1d_meta_forward(x, weight, bias, kernel_size=K, dilation=DILATION)
    out = jax.block_until_ready(out)
    assert out.shape == (B, C_OUT, L), out.shape
    assert jnp.allclose(out, ref, atol=5e-2, rtol=5e-2), "bf16 mismatch vs reference"

    # Opt-out full-f32 operand path, tight tolerance.
    out_f32 = conv1d_meta_forward(
        x, weight, bias, kernel_size=K, dilation=DILATION, compute_dtype=None
    )
    out_f32 = jax.block_until_ready(out_f32)
    assert jnp.allclose(out_f32, ref, atol=1e-4, rtol=1e-4), "f32 mismatch vs reference"

    print("KERNEL_OK")
</pallas_src>

<mosaic_0001>
module attributes {stable_mosaic.version = 11 : i64} {
  func.func @_conv1d_kernel(%arg0: i32, %arg1: i32, %arg2: memref<1x4x16xbf16, #tpu.memory_space<vmem>>, %arg3: memref<3x8x4xbf16, #tpu.memory_space<vmem>>, %arg4: memref<8x1xf32, #tpu.memory_space<vmem>>, %arg5: memref<1x8x16xf32, #tpu.memory_space<vmem>>) attributes {dimension_semantics = [#tpu.dimension_semantics<parallel>, #tpu.dimension_semantics<parallel>], iteration_bounds = array<i64: 2, 1>, scalar_prefetch = 0 : i64, scratch_operands = 0 : i64, tpu.core_type = #tpu.core_type<tc>, window_params = [{transform_indices = @transform_0, window_bounds = array<i64: 1, 4, 16>}, {pipeline_mode = #tpu.pipeline_mode<synchronous>, transform_indices = @transform_1, window_bounds = array<i64: 3, 8, 4>}, {pipeline_mode = #tpu.pipeline_mode<synchronous>, transform_indices = @transform_2, window_bounds = array<i64: 8, 1>}, {transform_indices = @transform_3, window_bounds = array<i64: 1, 8, 16>}]} {
    %c0 = arith.constant 0 : index
    %c0_0 = arith.constant 0 : index
    %c0_1 = arith.constant 0 : index
    %0 = vector.load %arg2[%c0, %c0_0, %c0_1] : memref<1x4x16xbf16, #tpu.memory_space<vmem>>, vector<1x4x16xbf16>
    %1 = vector.shape_cast %0 : vector<1x4x16xbf16> to vector<4x16xbf16>
    %2 = vector.extract_strided_slice %1 {offsets = [0, 15], sizes = [4, 1], strides = [1, 1]} : vector<4x16xbf16> to vector<4x1xbf16>
    %3 = vector.extract_strided_slice %1 {offsets = [0, 0], sizes = [4, 15], strides = [1, 1]} : vector<4x16xbf16> to vector<4x15xbf16>
    %4 = tpu.concatenate %2, %3 in 1 : vector<4x1xbf16>, vector<4x15xbf16> -> vector<4x16xbf16>
    %c0_2 = arith.constant 0 : index
    %c0_3 = arith.constant 0 : index
    %c0_4 = arith.constant 0 : index
    %5 = vector.load %arg3[%c0_2, %c0_3, %c0_4] : memref<3x8x4xbf16, #tpu.memory_space<vmem>>, vector<1x8x4xbf16>
    %6 = vector.shape_cast %5 : vector<1x8x4xbf16> to vector<8x4xbf16>
    %cst = arith.constant dense<0.000000e+00> : vector<8x16xf32>
    %7 = tpu.matmul %6, %4, %cst {dimension_numbers = #tpu.dot_dimension_numbers<[1], [0], [0], [1], [0, 0, 1, 1], [], []>} : vector<8x4xbf16>, vector<4x16xbf16>, vector<8x16xf32> -> vector<8x16xf32>
    %c1 = arith.constant 1 : index
    %c0_5 = arith.constant 0 : index
    %c0_6 = arith.constant 0 : index
    %8 = vector.load %arg3[%c1, %c0_5, %c0_6] : memref<3x8x4xbf16, #tpu.memory_space<vmem>>, vector<1x8x4xbf16>
    %9 = vector.shape_cast %8 : vector<1x8x4xbf16> to vector<8x4xbf16>
    %cst_7 = arith.constant dense<0.000000e+00> : vector<8x16xf32>
    %10 = tpu.matmul %9, %1, %cst_7 {dimension_numbers = #tpu.dot_dimension_numbers<[1], [0], [0], [1], [0, 0, 1, 1], [], []>} : vector<8x4xbf16>, vector<4x16xbf16>, vector<8x16xf32> -> vector<8x16xf32>
    %11 = arith.addf %7, %10 : vector<8x16xf32>
    %12 = vector.extract_strided_slice %1 {offsets = [0, 1], sizes = [4, 15], strides = [1, 1]} : vector<4x16xbf16> to vector<4x15xbf16>
    %13 = vector.extract_strided_slice %1 {offsets = [0, 0], sizes = [4, 1], strides = [1, 1]} : vector<4x16xbf16> to vector<4x1xbf16>
    %14 = tpu.concatenate %12, %13 in 1 : vector<4x15xbf16>, vector<4x1xbf16> -> vector<4x16xbf16>
    %c2 = arith.constant 2 : index
    %c0_8 = arith.constant 0 : index
    %c0_9 = arith.constant 0 : index
    %15 = vector.load %arg3[%c2, %c0_8, %c0_9] : memref<3x8x4xbf16, #tpu.memory_space<vmem>>, vector<1x8x4xbf16>
    %16 = vector.shape_cast %15 : vector<1x8x4xbf16> to vector<8x4xbf16>
    %cst_10 = arith.constant dense<0.000000e+00> : vector<8x16xf32>
    %17 = tpu.matmul %16, %14, %cst_10 {dimension_numbers = #tpu.dot_dimension_numbers<[1], [0], [0], [1], [0, 0, 1, 1], [], []>} : vector<8x4xbf16>, vector<4x16xbf16>, vector<8x16xf32> -> vector<8x16xf32>
    %18 = arith.addf %11, %17 : vector<8x16xf32>
    %c0_11 = arith.constant 0 : index
    %c0_12 = arith.constant 0 : index
    %19 = vector.load %arg4[%c0_11, %c0_12] : memref<8x1xf32, #tpu.memory_space<vmem>>, vector<8x1xf32>
    %20 = vector.broadcast %19 : vector<8x1xf32> to vector<8x16xf32>
    %21 = arith.addf %18, %20 : vector<8x16xf32>
    %c0_13 = arith.constant 0 : index
    %c0_14 = arith.constant 0 : index
    %c0_15 = arith.constant 0 : index
    %22 = vector.load %arg5[%c0_13, %c0_14, %c0_15] : memref<1x8x16xf32, #tpu.memory_space<vmem>>, vector<1x8x16xf32>
    %23 = vector.shape_cast %22 : vector<1x8x16xf32> to vector<8x16xf32>
    %24 = vector.shape_cast %21 : vector<8x16xf32> to vector<1x8x16xf32>
    tpu.vector_store %arg5[%c0_13, %c0_14, %c0_15], %24 {strides = array<i32>} : memref<1x8x16xf32, #tpu.memory_space<vmem>>, vector<1x8x16xf32>,
    return
  }
  func.func @transform_0(%arg0: i32, %arg1: i32) -> (i32, i32, i32) {
    %c0_i32 = arith.constant 0 : i32
    %c0_i32_0 = arith.constant 0 : i32
    %c0_i32_1 = arith.constant 0 : i32
    return %arg0, %c0_i32, %c0_i32_0 : i32, i32, i32
  }
  func.func @transform_1(%arg0: i32, %arg1: i32) -> (i32, i32, i32) {
    %c0_i32 = arith.constant 0 : i32
    %c0_i32_0 = arith.constant 0 : i32
    %c0_i32_1 = arith.constant 0 : i32
    %c0_i32_2 = arith.constant 0 : i32
    return %c0_i32, %c0_i32_0, %c0_i32_1 : i32, i32, i32
  }
  func.func @transform_2(%arg0: i32, %arg1: i32) -> (i32, i32) {
    %c0_i32 = arith.constant 0 : i32
    %c0_i32_0 = arith.constant 0 : i32
    %c0_i32_1 = arith.constant 0 : i32
    return %c0_i32, %c0_i32_0 : i32, i32
  }
  func.func @transform_3(%arg0: i32, %arg1: i32) -> (i32, i32, i32) {
    %c0_i32 = arith.constant 0 : i32
    %c0_i32_0 = arith.constant 0 : i32
    return %arg0, %c0_i32, %arg1 : i32, i32, i32
  }
}

</mosaic_0001>

<bundles_post_ra>
// kernel: tpu_custom_call.1
= control target key start
LH: loop header
LB: loop body
LE: loop exit
PB: predicated region body
PF: predicated region fallthrough
CT: control target
= control target key end

     0   :  { %8 = vsyncpa [#allocation3], 0  ;;  %s788_s0 = inlined_call_operand.vmem [shape: bf16[2,4,16], index: 0, kind: input, shape index: {}]   ;;  %s789_s1 = inlined_call_operand.vmem [shape: bf16[3,8,4], index: 1, kind: input, shape index: {}]   ;;  %s790_s2 = inlined_call_operand.vmem [shape: f32[8,1], index: 2, kind: input, shape index: {}]   ;;  %s791_s3 = inlined_call_operand.hbm [shape: f32[2,8,16], index: 3, kind: output, shape index: {}]  }
   0x1   :  { %10 = vsyncpa [#allocation3 + $0x1], 0  ;;  %s655_s12 = smov 0   ;;  %s657_s13 = smov 0  }
   0x2   :  { %s659_s14 = smov 0   ;;  %s661_s15 = smov 0  }
   0x3   :  { %s663_s16 = smov 0   ;;  %s665_s17 = smov 0  }
   0x4 LB: > { %s442_s18 = sadd.s32 4294967295, %s624_s17   ;;  %s443_s19 = sadd.s32 4294967294, %s624_s17   ;;  %s624_s17 = sphi %s665_s17, %s16_s17   ;;  %s620_s16 = sphi %s663_s16, %s798_s16   ;;  %s616_s15 = sphi %s661_s15, %s797_s15   ;;  %s612_s14 = sphi %s659_s14, %s796_s14   ;;  %s608_s13 = sphi %s657_s13, %s795_s13   ;;  %s604_s12 = sphi %s655_s12, %s794_s12  }
   0x5   : > { %s28_s20 = sadd.s32 1, %s620_s16  ;;  %s105_s21 = sadd.s32 1, %s612_s14 }
   0x6   : > { %p30_p0 = scmp.ge.s32.totalorder %s28_s20, 2  ;;  %p115_p1 = scmp.ne.s32.totalorder %s612_s14, %s608_s13 }
   0x7   : > { %p116_p2 = scmp.eq.s32.totalorder %s442_s18, 1  ;;  %p121_p3 = scmp.ne.s32.totalorder %s608_s13, %s604_s12 }
   0x8   : > { %s800_s20 = smov (%p30_p0, %s28_s20), 0  ;;  %p122_p5 = scmp.eq.s32.totalorder %s443_s19, 1 }
   0x9   : > { %p695_p4 = por %p116_p2, %p115_p1  ;;  %s100_s23 = ssub.s32 %s620_s16, %s800_s20 }
   0xa   : > { %p446_p6 = scmp.ge.s32.totalorder %s624_s17, 1  ;;  %p103_p7 = scmp.eq.s32.totalorder %s100_s23, 0 }
   0xb   : > { %p702_p8 = por %p122_p5, %p121_p3  ;;  %p153_p9 = scmp.lt.s32.totalorder %s624_s17, 3 }
   0xc   : > { %s708_s25 = scalar_select %p103_p7, %s612_s14, %s105_s21  }
   0xd   : > { %p154_p10 = pnand %p446_p6, %p153_p9 }
   0xe   : > { %p176_p11 = scmp.lt.s32.totalorder (!%p154_p10), %s616_s15, 1  ;;  %v186_v0 = vlaneseq (!%p154_p10)  ;;  %v626_v1 = vmov (!%p154_p10), 1983009808   ;;  %v627_v3 = vmov (!%p154_p10), 0.0   ;;  %vm628_vm0 = vmmov (!%p154_p10), 0   ;;  %s630_s6 = smov (!%p154_p10), 127  }
   0xf   : > { %157 = sbr.rel (%p154_p10) target bundleno = 385 (0x181), region = 32  ;;  %v184_v2 = vunpack.c.l.s4 (!%p154_p10), %v626_v1  ;;  %464 = vmatprep.subr.bf16.mxu0 (!%p154_p10), %v627_v3  ;;  %470 = vmatprep.subr.bf16.mxu1 (!%p154_p10), %v627_v3  ;;  %vm205_vm1 = vcmask (!%p154_p10), 1041408   ;;  %v629_v8 = vmov (!%p154_p10), 0   ;;  %v449_v11 = vld [vmem:[%s789_s1 + $0x4] sm:$0xf] (!%p154_p10)  ;;  %vm201_vm2 = vcmask (!%p154_p10), 31744  }
  0x10   : > { %v187_v4 = vshrl.u32 (!%p154_p10), %v186_v0, 7  ;;  %466 = vmatprep.mubr.msk.bf16.mxu0 (!%p154_p10), %vm628_vm0, %v627_v3  ;;  %472 = vmatprep.mubr.msk.bf16.mxu1 (!%p154_p10), %vm628_vm0, %v627_v3  ;;  %s631_s7 = smov (!%p154_p10), 113   ;;  %s632_s8 = smov (!%p154_p10), 15   ;;  %v350_v12 = vld [vmem:[%s790_s2] sm:$0xff] (!%p154_p10)  ;;  %vm298_vm3 = vcmask (!%p154_p10), 121856   ;;  %vm194_vm4 = vcmask (!%p154_p10), 7168  }
  0x11   : > { %v185_v5 = vunpack.c.0.s8 (!%p154_p10), %v184_v2  ;;  %545 = vset.pattern.permute.xlu0 (!%p154_p10), %v629_v8  ;;  %s633_s9 = smov (!%p154_p10), 1   ;;  %v198_v21 = vld [vmem:[%s789_s1] sm:$0xf] (!%p154_p10)  ;;  %v452_v22 = vld [vmem:[%s789_s1 + $0x8] sm:$0xf] (!%p154_p10)  ;;  %s455_s28 = sshll.u32 (!%p154_p10), %s616_s15, 7 }
  0x12   : > { %vm357_vm5 = vcmask (!%p154_p10), 130048  }
  0x13   : > { %v188_v6 = vsub.s32 (!%p154_p10), %v185_v5, %v187_v4 }
  0x16   : > { %s177_s26 = scalar_select %p176_p11, %s616_s15, 1 }
  0x18   : > { %s448_s27 = sshll.u32 %s177_s26, 1  ;;  %s173_s26 = sand.u32 1, %s608_s13  }
  0x19   : > { %s179_s30 = scalar_lea.vmem %s788_s0, %s448_s27  ;;  %s447_s27 = sshll.u32 %s173_s26, 3 }
  0x1a   : > { %v181_v7 = vld [vmem:[%s179_s30] sm:$0x3]  ;;  %s175_s29 = scalar_lea.vmem [#allocation2], %s447_s27 }
  0x1b   : > { %v189_v9 = vrot.slane %v181_v7, %v188_v6  ;;  %v207_v10 = vsel %vm205_vm1, %v181_v7, 0  ;;  %s374_s30 = sshll.u32 %s175_s29, 4  ;;  %s743_s30 = int_to_ptr.vmem [resolvable:$true] %s374_s30 }
  0x1c   : > { %465 = vmatpush3.bf16.msra.mxu0 %v207_v10  ;;  %s546_s15 = scalar_lea.vmem %s743_s30, 128 }
  0x1d   : > { %294 = vrot.lane.b32.xlu1 %v189_v9, %s630_s6  ;;  %190 = vrot.lane.b32.xlu0 %v189_v9, %s631_s7  ;;  %s741_s6 = scalar_lea.hbm %s791_s3, %s455_s28  ;;  %s360_s7 = scalar_lea.sflag [#allocation3], %s173_s26 }
  0x1e   : > { %476 = vmatprep.subr.bf16.mxu0 %v627_v3  ;;  %p547_p12 = scmp.ne.s32.totalorder %s743_s30, %s546_s15 }
  0x1f   : > { %467 = vmatmul.mubr.msk.bf16.vlgmr.msra.gmra.mrb[0].mxu0 %vm201_vm2, %v449_v11 }
  0x20   : > { %478 = vmatprep.mubr.msk.bf16.mxu0 %vm628_vm0, %v627_v3  ;;  %p548_p13 = pnand %p547_p12, %p695_p4 }
  0x21   : > { %296 = vrot.lane.b32.xlu1 %v189_v9, %s632_s8  ;;  %192 = vrot.lane.b32.xlu0 %v189_v9, %s633_s9  ;;  %s634_s8 = smov [#allocation2]  }
  0x22   : > { %p549_p0 = pneg %p548_p13  ;;  %s550_s9 = sshll.u32 %s634_s8, 4  ;;  %s551_s9 = int_to_ptr.vmem [resolvable:$false] %s550_s9 }
  0x23   : > { %s552_s10 = scalar_lea.vmem %s551_s9, 256  ;;  %p553_p1 = scmp.lt.s32.totalorder %s743_s30, %s551_s9 }
  0x24   : > { %p554_p2 = scmp.lt.s32.totalorder %s552_s10, %s546_s15 }
  0x25   : > { %353 = vperm.xlu0 %545, %v350_v12  }
  0x26   : > { %p555_p3 = por %p554_p2, %p553_p1 }
  0x28   : > { %p556_p5 = pnand %p555_p3, %p549_p0 }
  0x8f   : > { %v295_v13 = vpop.permute.xlu1 %294  ;;  %v191_v14 = vpop.permute.xlu0 %190 }
  0x93   : > { %v297_v15 = vpop.permute.xlu1 %296  ;;  %v193_v16 = vpop.permute.xlu0 %192 }
  0x94   : > { %v301_v17 = vsel %vm298_vm3, %v295_v13, %v297_v15  ;;  %v197_v18 = vsel %vm194_vm4, %v191_v14, %v193_v16 }
  0x95   : > { %v307_v19 = vsel %vm205_vm1, %v301_v17, 0  ;;  %v252_v20 = vsel %vm205_vm1, %v197_v18, 0 }
  0x96   : > { %471 = vmatpush3.bf16.msra.mxu1 %v252_v20  ;;  %477 = vmatpush3.bf16.msra.mxu0 %v307_v19 }
  0x99   : > { %473 = vmatmul.mubr.msk.bf16.vlgmr.msra.gmra.mrb[0].mxu1 %vm201_vm2, %v198_v21  ;;  %479 = vmatmul.mubr.msk.bf16.vlgmr.msra.gmra.mrb[4].mxu0 %vm201_vm2, %v452_v22 }
  0xa4   : > { %v354_v27 = vpop.permute.xlu0 %353 }
  0xf2   : > { %v243_v23 = vpop.f32.mrb[0].mxu0 }
  0xf3   : > { %v468_v24 = vpop.f32.mrb[1].mxu0 }
  0xf4   : > { %v246_v25 = vpop.f32.mrb[2].mxu0 }
  0xf5   : > { %v469_v26 = vpop.f32.mrb[3].mxu0 }
 0x16c   : > { %v288_v28 = vpop.f32.mrb[0].mxu1  ;;  %v343_v29 = vpop.f32.mrb[4].mxu0 }
 0x16d   : > { %v289_v30 = vadd.f32 %v288_v28, %v243_v23  ;;  %v474_v31 = vpop.f32.mrb[1].mxu1  ;;  %v480_v32 = vpop.f32.mrb[5].mxu0 }
 0x16e   : > { %v291_v33 = vpop.f32.mrb[2].mxu1  ;;  %v346_v34 = vpop.f32.mrb[6].mxu0 }
 0x16f   : > { %v349_v35 = vadd.f32 %v343_v29, %v289_v30  ;;  %v475_v36 = vpop.f32.mrb[3].mxu1  ;;  %v481_v37 = vpop.f32.mrb[7].mxu0 }
 0x171   : > { %v356_v38 = vadd.f32 %v354_v27, %v349_v35 }
 0x173   : > { %358 = vst.msk [vmem:[%s175_s29] sm:$0xff] %vm357_vm5, %v356_v38 }
 0x174   : > { %559 = shalt.err (!%p556_p5)
}
 0x175   : > { %s560_s11 = scalar_lea.hbm %s741_s6, 128  ;;  %s564_s21 = scalar_lea.hbm %s791_s3, 256 }
 0x176   : > { %p561_p6 = scmp.ne.s32.totalorder %s741_s6, %s560_s11  ;;  %p565_p10 = scmp.lt.u32.totalorder %s741_s6, %s791_s3 }
 0x177   : > { %p566_p11 = scmp.lt.u32.totalorder %s564_s21, %s560_s11  ;;  %p568_p13 = scmp.lt.u32.totalorder %s560_s11, %s741_s6 }
 0x178   : > { %p562_p7 = pnand %p561_p6, %p695_p4 }
 0x179   : > { %p567_p12 = por %p566_p11, %p565_p10 }
 0x17a   : > { %p563_p9 = pneg %p562_p7 }
 0x17b   : > { %p569_p0 = por %p568_p13, %p567_p12 }
 0x17d   : > { %p570_p1 = pnand %p569_p0, %p563_p9 }
 0x17f   : > { %573 = shalt.err (!%p570_p1)
}
 0x180   : > { %482 = dma.vmem_to_hbm [thread:$0]  (%p695_p4), %s743_s30, 128, %s741_s6, %s360_s7  }
 0x181 PF: > { %p488_p2 = scmp.ge.s32.totalorder %s624_s17, 2  ;;  %s386_s27 = sand.u32 1, %s604_s12  }
 0x182   : > { %s387_s28 = scalar_lea.sflag [#allocation3], %s386_s27 }
 0x183   : > { %p485_p3 = pnand %p488_p2, %p702_p8 }
 0x185   : > { %599 = dma.done.wait (!%p485_p3), %s387_s28, 128  }
 0x186   : > { %601 = vsyncadd (!%p485_p3), %s387_s28, 4294967168  ;;  %s16_s17 = sadd.s32 1, %s624_s17   ;;  %s794_s12 = smov %s608_s13 }
 0x187   : > { %p13_p5 = scmp.ge.s32.totalorder %s16_s17, 4   ;;  %s795_s13 = smov %s612_s14 }
 0x188   : > { %s796_s14 = smov %s708_s25  ;;  %s797_s15 = smov %s620_s16 }
 0x189   : > { %s798_s16 = smov %s800_s20  ;;  %15 = sbr.rel (!%p13_p5) target bundleno = 4 (0x4), region = 69 }
 0x190   :  { %392 = vsyncpa [#allocation3], 1 }
 0x191   :  { %394 = vsyncpa [#allocation3 + $0x1], 1 }

</bundles_post_ra>
